<compile_context>
chip_gen: v6e
topology: v6e:2x2x1
jax: 0.10.0
libtpu: 0.0.40
codegen_flags: <defaults>
</compile_context>

<pallas_src>
import jax
import jax.numpy as jnp
from jax.experimental import pallas as pl
from jax.experimental.pallas import tpu as pltpu


def _round_up(x, m):
    return (x + m - 1) // m * m


def _pick_tile(dim, candidates=(512, 256, 128)):
    for c in candidates:
        if dim % c == 0:
            return c
    return dim


# ----------------------------------------------------------------------------
# Pallas kernel: y = (mask * x) @ W + b   (the nn.Linear inside enc_mapping,
# with the per-row mask folded into the finalize step).
# ----------------------------------------------------------------------------
def enc_mapping_kernel(x_ref, w_ref, m_ref, b_ref, o_ref, acc_ref):
    # x_ref: (tm, tk)  w_ref: (tk, tn)  m_ref: (tm, 1)  b_ref: (1, tn)
    # o_ref: (tm, tn)  acc_ref: (tm, tn) f32 scratch
    k = pl.program_id(2)

    @pl.when(k == 0)
    def _init():
        acc_ref[...] = jnp.zeros_like(acc_ref)

    acc_ref[...] += jnp.dot(
        x_ref[...], w_ref[...], preferred_element_type=jnp.float32
    )

    @pl.when(k == pl.num_programs(2) - 1)
    def _finalize():
        # mask is a per-row scale, so (m*x)@W == m*(x@W); apply once here.
        o_ref[...] = (acc_ref[...] * m_ref[...] + b_ref[...]).astype(o_ref.dtype)


def enc_mapping(x_2d, mask_col, weight, bias):
    """(mask * x) @ W + b.

    x_2d: (M, H) f32, mask_col: (M, 1) f32, weight: (H, D) f32, bias: (D,) f32
    returns (M, D) f32.
    """
    M, H = x_2d.shape
    D = weight.shape[1]

    # --- Tile selection -------------------------------------------------------
    # Row tile: as big as possible (up to 512, safe for v7x's smaller VMEM);
    # for small problems just one padded tile.
    if M <= 512:
        tm = _round_up(M, 8)
        M_pad = tm
    else:
        tm = 512
        M_pad = _round_up(M, tm)

    # N tile: pad D to a multiple of 128 so output stores are lane-dense.
    D_pad = _round_up(D, 128)
    tn = _pick_tile(D_pad)

    # K tile: pad H to a multiple of 128 when big enough to tile; otherwise a
    # single full-H block (last-dim == full array dim satisfies layout rules).
    if H >= 128:
        H_pad = _round_up(H, 128)
        tk = _pick_tile(H_pad)
    else:
        H_pad = H
        tk = H

    # --- Zero-pad operands (no-ops when already aligned) ----------------------
    x_p = jnp.pad(x_2d, ((0, M_pad - M), (0, H_pad - H)))
    w_p = jnp.pad(weight, ((0, H_pad - H), (0, D_pad - D)))
    b_p = jnp.pad(bias, (0, D_pad - D)).reshape(1, D_pad)
    m_p = jnp.pad(mask_col, ((0, M_pad - M), (0, 0)))

    grid = (M_pad // tm, D_pad // tn, H_pad // tk)

    cost = pl.CostEstimate(
        flops=2 * M_pad * H_pad * D_pad,
        transcendentals=0,
        bytes_accessed=4 * (M_pad * H_pad + H_pad * D_pad + M_pad * D_pad
                            + M_pad + D_pad),
    )

    out = pl.pallas_call(
        enc_mapping_kernel,
        out_shape=jax.ShapeDtypeStruct((M_pad, D_pad), x_2d.dtype),
        grid_spec=pltpu.PrefetchScalarGridSpec(
            num_scalar_prefetch=0,
            grid=grid,
            in_specs=[
                pl.BlockSpec((tm, tk), lambda i, j, k: (i, k)),  # activations
                pl.BlockSpec((tk, tn), lambda i, j, k: (k, j)),  # weight tile
                pl.BlockSpec((tm, 1), lambda i, j, k: (i, 0)),   # per-row mask
                pl.BlockSpec((1, tn), lambda i, j, k: (0, j)),   # bias row
            ],
            out_specs=pl.BlockSpec((tm, tn), lambda i, j, k: (i, j)),
            scratch_shapes=[pltpu.VMEM((tm, tn), jnp.float32)],
        ),
        compiler_params=pltpu.CompilerParams(
            # M/N axes parallel (shards across v7x's 2 TCs); K is the reduction.
            dimension_semantics=("parallel", "parallel", "arbitrary"),
        ),
        cost_estimate=cost,
    )(x_p, w_p, m_p, b_p)

    return out[:M, :D]


# ----------------------------------------------------------------------------
# Encoder forward (glue in plain JAX, hot path in Pallas)
# ----------------------------------------------------------------------------
def encoder_forward(input_ids, params, e_mask=None):
    """input_ids: (B, S) int32 token ids -> (B, S, hidden_dim) float32."""
    # TODO(synk): the real `ple` is a pretrained transformer encoder; stand-in is a
    # deterministic embedding lookup producing last_hidden_state (B, S, H). For a
    # production embedding path, fuse the gather via scalar-prefetched token ids.
    last_hidden_state = jnp.take(params["ple_embed"], input_ids, axis=0)  # (B, S, H)

    B, S, H = last_hidden_state.shape
    D = params["enc_w"].shape[1]
    x_2d = last_hidden_state.reshape(B * S, H)

    if e_mask is not None:
        mask_col = e_mask.reshape(B * S, 1).astype(x_2d.dtype)
    else:
        mask_col = jnp.ones((B * S, 1), x_2d.dtype)

    y_2d = enc_mapping(x_2d, mask_col, params["enc_w"], params["enc_b"])
    # Dropout(config.dropout_ratio) is identity in eval mode -> no-op here.
    return y_2d.reshape(B, S, D)


# ----------------------------------------------------------------------------
# Deterministic parameter init (shapes from Encoder.__init__)
# ----------------------------------------------------------------------------
def init_params(key, vocab_size, hidden_size, hidden_dim):
    k0, k1, k2 = jax.random.split(key, 3)
    bound = 1.0 / jnp.sqrt(hidden_size)  # matches nn.Linear default init range
    return {
        "ple_embed": jax.random.normal(k0, (vocab_size, hidden_size), jnp.float32) * 0.02,
        "enc_w": jax.random.uniform(k1, (hidden_size, hidden_dim), jnp.float32,
                                    -bound, bound),
        "enc_b": jax.random.uniform(k2, (hidden_dim,), jnp.float32, -bound, bound),
    }


if __name__ == "__main__":
    # Small shapes consistent with the module's forward:
    #   ple.config.hidden_size = 32, config.hidden_dim = 64, batch=2, seq=8
    B, S = 2, 8
    vocab_size, hidden_size, hidden_dim = 100, 32, 64

    key = jax.random.PRNGKey(0)
    kp, kx = jax.random.split(key)
    params = init_params(kp, vocab_size, hidden_size, hidden_dim)

    input_ids = jax.random.randint(kx, (B, S), 0, vocab_size, dtype=jnp.int32)
    e_mask = jnp.ones((B, S), dtype=jnp.int32)

    out = encoder_forward(input_ids, params, e_mask)
    out = jax.block_until_ready(out)

    # Pure-JAX reference check of the fused mask + matmul + bias path.
    hs = jnp.take(params["ple_embed"], input_ids, axis=0) * e_mask[..., None]
    ref = hs.reshape(B * S, hidden_size) @ params["enc_w"] + params["enc_b"]
    ref = ref.reshape(B, S, hidden_dim)
    assert out.shape == (B, S, hidden_dim)
    assert jnp.allclose(out, ref, atol=1e-5, rtol=1e-5)

    print("KERNEL_OK")
</pallas_src>

<mosaic_0001>
module attributes {stable_mosaic.version = 11 : i64} {
  func.func @enc_mapping_kernel(%arg0: i32, %arg1: i32, %arg2: i32, %arg3: memref<16x32xf32, #tpu.memory_space<vmem>>, %arg4: memref<32x128xf32, #tpu.memory_space<vmem>>, %arg5: memref<16x1xf32, #tpu.memory_space<vmem>>, %arg6: memref<1x128xf32, #tpu.memory_space<vmem>>, %arg7: memref<16x128xf32, #tpu.memory_space<vmem>>, %arg8: memref<16x128xf32, #tpu.memory_space<vmem>>) attributes {dimension_semantics = [#tpu.dimension_semantics<parallel>, #tpu.dimension_semantics<parallel>, #tpu.dimension_semantics<arbitrary>], iteration_bounds = array<i64: 1, 1, 1>, scalar_prefetch = 0 : i64, scratch_operands = 1 : i64, tpu.core_type = #tpu.core_type<tc>, window_params = [{transform_indices = @transform_0, window_bounds = array<i64: 16, 32>}, {transform_indices = @transform_1, window_bounds = array<i64: 32, 128>}, {transform_indices = @transform_2, window_bounds = array<i64: 16, 1>}, {transform_indices = @transform_3, window_bounds = array<i64: 1, 128>}, {transform_indices = @transform_4, window_bounds = array<i64: 16, 128>}]} {
    %c0_i32 = arith.constant 0 : i32
    %0 = arith.cmpi eq, %arg2, %c0_i32 : i32
    %1 = arith.extui %0 : i1 to i32
    %c0_i32_0 = arith.constant 0 : i32
    %2 = arith.cmpi ne, %1, %c0_i32_0 : i32
    scf.if %2 {
      %cst_10 = arith.constant 0.000000e+00 : f32
      %12 = vector.broadcast %cst_10 : f32 to vector<16x128xf32>
      %c0_11 = arith.constant 0 : index
      %c0_12 = arith.constant 0 : index
      %13 = vector.load %arg8[%c0_11, %c0_12] : memref<16x128xf32, #tpu.memory_space<vmem>>, vector<16x128xf32>
      tpu.vector_store %arg8[%c0_11, %c0_12], %12 {strides = array<i32>} : memref<16x128xf32, #tpu.memory_space<vmem>>, vector<16x128xf32>,
    } else {
    }
    %c0 = arith.constant 0 : index
    %c0_1 = arith.constant 0 : index
    %3 = vector.load %arg8[%c0, %c0_1] : memref<16x128xf32, #tpu.memory_space<vmem>>, vector<16x128xf32>
    %c0_2 = arith.constant 0 : index
    %c0_3 = arith.constant 0 : index
    %4 = vector.load %arg3[%c0_2, %c0_3] : memref<16x32xf32, #tpu.memory_space<vmem>>, vector<16x32xf32>
    %c0_4 = arith.constant 0 : index
    %c0_5 = arith.constant 0 : index
    %5 = vector.load %arg4[%c0_4, %c0_5] : memref<32x128xf32, #tpu.memory_space<vmem>>, vector<32x128xf32>
    %cst = arith.constant dense<0.000000e+00> : vector<16x128xf32>
    %6 = tpu.matmul %4, %5, %cst {dimension_numbers = #tpu.dot_dimension_numbers<[1], [0], [0], [1], [0, 0, 1, 1], [], []>} : vector<16x32xf32>, vector<32x128xf32>, vector<16x128xf32> -> vector<16x128xf32>
    %7 = arith.addf %3, %6 : vector<16x128xf32>
    %c0_6 = arith.constant 0 : index
    %c0_7 = arith.constant 0 : index
    %8 = vector.load %arg8[%c0_6, %c0_7] : memref<16x128xf32, #tpu.memory_space<vmem>>, vector<16x128xf32>
    tpu.vector_store %arg8[%c0_6, %c0_7], %7 {strides = array<i32>} : memref<16x128xf32, #tpu.memory_space<vmem>>, vector<16x128xf32>,
    %c0_i32_8 = arith.constant 0 : i32
    %9 = arith.cmpi eq, %arg2, %c0_i32_8 : i32
    %10 = arith.extui %9 : i1 to i32
    %c0_i32_9 = arith.constant 0 : i32
    %11 = arith.cmpi ne, %10, %c0_i32_9 : i32
    scf.if %11 {
      %c0_10 = arith.constant 0 : index
      %c0_11 = arith.constant 0 : index
      %12 = vector.load %arg8[%c0_10, %c0_11] : memref<16x128xf32, #tpu.memory_space<vmem>>, vector<16x128xf32>
      %c0_12 = arith.constant 0 : index
      %c0_13 = arith.constant 0 : index
      %13 = vector.load %arg5[%c0_12, %c0_13] : memref<16x1xf32, #tpu.memory_space<vmem>>, vector<16x1xf32>
      %14 = vector.broadcast %13 : vector<16x1xf32> to vector<16x128xf32>
      %15 = arith.mulf %12, %14 : vector<16x128xf32>
      %c0_14 = arith.constant 0 : index
      %c0_15 = arith.constant 0 : index
      %16 = vector.load %arg6[%c0_14, %c0_15] : memref<1x128xf32, #tpu.memory_space<vmem>>, vector<1x128xf32>
      %17 = vector.broadcast %16 : vector<1x128xf32> to vector<16x128xf32>
      %18 = arith.addf %15, %17 : vector<16x128xf32>
      %c0_16 = arith.constant 0 : index
      %c0_17 = arith.constant 0 : index
      %19 = vector.load %arg7[%c0_16, %c0_17] : memref<16x128xf32, #tpu.memory_space<vmem>>, vector<16x128xf32>
      tpu.vector_store %arg7[%c0_16, %c0_17], %18 {strides = array<i32>} : memref<16x128xf32, #tpu.memory_space<vmem>>, vector<16x128xf32>,
    } else {
    }
    return
  }
  func.func @transform_0(%arg0: i32, %arg1: i32, %arg2: i32) -> (i32, i32) {
    %c0_i32 = arith.constant 0 : i32
    return %arg0, %arg2 : i32, i32
  }
  func.func @transform_1(%arg0: i32, %arg1: i32, %arg2: i32) -> (i32, i32) {
    %c0_i32 = arith.constant 0 : i32
    return %arg2, %arg1 : i32, i32
  }
  func.func @transform_2(%arg0: i32, %arg1: i32, %arg2: i32) -> (i32, i32) {
    %c0_i32 = arith.constant 0 : i32
    %c0_i32_0 = arith.constant 0 : i32
    return %arg0, %c0_i32 : i32, i32
  }
  func.func @transform_3(%arg0: i32, %arg1: i32, %arg2: i32) -> (i32, i32) {
    %c0_i32 = arith.constant 0 : i32
    %c0_i32_0 = arith.constant 0 : i32
    return %c0_i32, %arg1 : i32, i32
  }
  func.func @transform_4(%arg0: i32, %arg1: i32, %arg2: i32) -> (i32, i32) {
    %c0_i32 = arith.constant 0 : i32
    return %arg0, %arg1 : i32, i32
  }
}

</mosaic_0001>

<bundles_post_ra>
// kernel: tpu_custom_call.1
= control target key start
LH: loop header
LB: loop body
LE: loop exit
PB: predicated region body
PF: predicated region fallthrough
CT: control target
= control target key end

     0   :  { %9 = vsyncpa [#allocation4], 0  ;;  %s308_s0 = inlined_call_operand.vmem [shape: f32[16,32], index: 0, kind: input, shape index: {}]   ;;  %s309_s1 = inlined_call_operand.hbm [shape: f32[32,128], index: 1, kind: input, shape index: {}]   ;;  %s310_s2 = inlined_call_operand.vmem [shape: f32[16,1], index: 2, kind: input, shape index: {}]   ;;  %s311_s3 = inlined_call_operand.vmem [shape: f32[1,128], index: 3, kind: input, shape index: {}]   ;;  %s312_s4 = inlined_call_operand.hbm [shape: f32[16,128], index: 4, kind: output, shape index: {}]  }
   0x1   :  { %10 = vsyncpa [#allocation5], 0  ;;  %s249_s15 = smov [#allocation3]  }
   0x2   :  { %s18_s16 = sshll.u32 %s249_s15, 4  ;;  %s19_s16 = int_to_ptr.vmem [resolvable:$true] %s18_s16 }
   0x3   :  { %s213_s17 = scalar_lea.vmem %s19_s16, 512  ;;  %p218_p1 = scmp.lt.s32.totalorder %s19_s16, %s19_s16 }
   0x4   :  { %p214_p0 = scmp.ne.s32.totalorder %s19_s16, %s213_s17  ;;  %p219_p2 = scmp.lt.s32.totalorder %s213_s17, %s213_s17 }
   0x6   :  { %p220_p3 = por %p219_p2, %p218_p1 }
   0x8   :  { %p221_p4 = pnand %p220_p3, %p214_p0 }
   0xa   :  { %224 = shalt.err (!%p221_p4)
}
   0xb   :  { %s250_s18 = smov 128   ;;  %s251_s19 = smov 8  }
   0xc   :  { %24 = dma.hbm_to_vmem [thread:$0]  %s309_s1, 512, %s19_s16, [#allocation4], %s250_s18, %s250_s18, %s251_s19  }
   0xd   :  { %245 = dma.done.wait [#allocation4], 512  }
   0xe   :  { %246 = vsyncadd [#allocation4], 4294966784  ;;  %v252_v0 = vmov 0   ;;  %vm46_vm0 = vcmask 261120   ;;  %v45_v1 = vld [vmem:[#allocation3 + $0x18] sm:$0xff]  ;;  %v44_v2 = vld [vmem:[#allocation3 + $0x10] sm:$0xff] }
   0xf   :  { %204 = vset.pattern.permute.xlu0 %v252_v0  ;;  %188 = vmatprep.subr.mxu0 %v45_v1  ;;  %v40_v3 = vld [vmem:[%s308_s0] sm:$0xff]  ;;  %v43_v4 = vld [vmem:[#allocation3 + $0x8] sm:$0xff] }
  0x10   :  { %189 = vmatpush3.msra.mxu0 %v45_v1  ;;  %196 = vmatprep.mubr.msk.f32.mxu0 %vm46_vm0, %v40_v3  ;;  %v137_v5 = vld [vmem:[%s310_s2] sm:$0xff]  ;;  %v138_v7 = vld [vmem:[%s310_s2 + $0x8] sm:$0xff]  ;;  %s253_s2 = smov [#allocation6]  }
  0x11   :  { %190 = vmatprep.subr.mxu0 %v44_v2  ;;  %141 = vperm.xlu0 %204, %v137_v5   ;;  %v42_v6 = vld [vmem:[#allocation3] sm:$0xff]  ;;  %v41_v8 = vld [vmem:[%s308_s0 + $0x8] sm:$0xff]  ;;  %s167_s5 = sshll.u32 %s253_s2, 4  ;;  %s168_s5 = int_to_ptr.vmem [resolvable:$true] %s167_s5 }
  0x12   :  { %191 = vmatpush3.msra.mxu0 %v44_v2  ;;  %v181_v12 = vld [vmem:[%s311_s3] ss:$0 sm:$0xff]  ;;  %s225_s0 = scalar_lea.vmem %s168_s5, 256  ;;  %p230_p6 = scmp.lt.s32.totalorder %s168_s5, %s168_s5 }
  0x13   :  { %192 = vmatprep.subr.mxu0 %v43_v4  ;;  %p226_p5 = scmp.ne.s32.totalorder %s168_s5, %s225_s0  ;;  %p231_p7 = scmp.lt.s32.totalorder %s225_s0, %s225_s0 }
  0x14   :  { %193 = vmatpush3.msra.mxu0 %v43_v4 }
  0x15   :  { %194 = vmatprep.subr.mxu0 %v42_v6  ;;  %146 = vperm.xlu0 %204, %v138_v7   ;;  %p232_p8 = por %p231_p7, %p230_p6 }
  0x16   :  { %195 = vmatpush3.msra.mxu0 %v42_v6 }
  0x17   :  { %197 = vmatmul.mubr.msk.f32.vlgmr.msra.gmra.mxu0 %vm46_vm0, %v41_v8  ;;  %p233_p9 = pnand %p232_p8, %p226_p5 }
  0x8c   :  { %v142_v9 = vpop.permute.xlu0 %141 }
  0x90   :  { %v147_v10 = vpop.permute.xlu0 %146 }
  0xd7   :  { %v198_v11 = vpop.f32.mrf.mxu0 }
  0xd8   :  { %v150_v13 = vmul.f32 %v198_v11, %v147_v10 }
  0xd9   :  { %v119_v14 = vpop.f32.mrf.mxu0 }
  0xda   :  { %v159_v15 = vadd.f32 %v181_v12, %v150_v13  ;;  %v149_v16 = vmul.f32 %v142_v9, %v119_v14 }
  0xdc   :  { %161 = vst [vmem:[#allocation6 + $0x8] sm:$0xff] %v159_v15  ;;  %v158_v17 = vadd.f32 %v181_v12, %v149_v16 }
  0xde   :  { %160 = vst [vmem:[#allocation6] sm:$0xff] %v158_v17 }
  0xdf   :  { %236 = shalt.err (!%p233_p9)
}
  0xe0   :  { %173 = dma.vmem_to_hbm [thread:$0]  %s168_s5, 256, %s312_s4, [#allocation5], %s250_s18, %s250_s18, %s251_s19  }
  0xe1   :  { %247 = dma.done.wait [#allocation5], 256  }
  0xe2   :  { %248 = vsyncadd [#allocation5], 4294967040 }
  0xe3   :  { %177 = vsyncpa [#allocation4], 1 }
  0xe4   :  { %178 = vsyncpa [#allocation5], 1 }

</bundles_post_ra>
